<compile_context>
chip_gen: v6e
topology: v6e:2x2x1
jax: 0.10.0
libtpu: 0.0.40
codegen_flags: <defaults>
</compile_context>

<pallas_src>
import jax
import jax.numpy as jnp
from jax.experimental import pallas as pl
from jax.experimental.pallas import tpu as pltpu

_LANE = 128      # lane width (last dim granularity)
_SUBLANE = 8     # f32 sublane granularity (second-to-last dim)


def _round_up(n, m):
    return ((n + m - 1) // m) * m


def _linear_kernel(x_ref, w_ref, b_ref, o_ref):
    # MXU matmul with f32 accumulation + VPU bias add, all in VMEM.
    acc = jnp.dot(x_ref[...], w_ref[...], preferred_element_type=jnp.float32)
    o_ref[...] = (acc + b_ref[...]).astype(o_ref.dtype)


def classifier_forward(x, w, b, *, tm_max=512):
    """Linear layer forward, matching torch.nn.Linear semantics.

    x: [B, F] float32
    w: [C, F] float32 (PyTorch Linear weight layout)
    b: [C]    float32
    returns: [B, C] float32 = x @ w.T + b
    """
    B, F = x.shape
    C, F2 = w.shape
    assert F == F2, "feature-dim mismatch"

    # --- lane-dense output: pad class dim to a multiple of 128 (zero cols) ---
    C_pad = _round_up(max(C, _LANE), _LANE)
    w_t = jnp.zeros((F, C_pad), x.dtype).at[:, :C].set(w.T)   # [F, C_pad]
    b2 = jnp.zeros((1, C_pad), x.dtype).at[0, :C].set(b)      # [1, C_pad]

    # --- batch tiling (sublane aligned, VMEM-budgeted) -----------------------
    # VMEM use ~ 2*(TM*F + TM*C_pad)*4B (double-buffered x/out) + F*C_pad*4B.
    # Cap TM so this stays far under v7x's 32 MiB scoped default.
    bytes_per_row = (F + C_pad) * 4
    budget = 16 * 1024 * 1024  # conservative half of the 32 MiB scoped limit
    tm_budget = max(_SUBLANE, (budget // (2 * bytes_per_row)) // _SUBLANE * _SUBLANE)
    TM = min(_round_up(B, _SUBLANE), tm_max, tm_budget)

    B_pad = _round_up(B, TM)
    if B_pad != B:
        x = jnp.zeros((B_pad, F), x.dtype).at[:B].set(x)

    grid = (B_pad // TM,)

    out = pl.pallas_call(
        _linear_kernel,
        out_shape=jax.ShapeDtypeStruct((B_pad, C_pad), x.dtype),
        grid_spec=pl.GridSpec(
            grid=grid,
            in_specs=[
                pl.BlockSpec((TM, F), lambda i: (i, 0)),       # x tile (pipelined)
                pl.BlockSpec((F, C_pad), lambda i: (0, 0)),    # weight (resident)
                pl.BlockSpec((1, C_pad), lambda i: (0, 0)),    # bias (resident)
            ],
            out_specs=pl.BlockSpec((TM, C_pad), lambda i: (i, 0)),
        ),
        compiler_params=pltpu.CompilerParams(
            dimension_semantics=("parallel",),   # shard batch tiles across TCs (v7x)
        ),
    )(x, w_t, b2)

    # Slice away batch/class padding.
    return out[:B, :C]


if __name__ == "__main__":
    # Small shapes consistent with the module defaults: input_size=16.
    batch = 8
    input_size = 16
    num_classes = 10

    key = jax.random.PRNGKey(0)
    kx, kw, kb = jax.random.split(key, 3)

    x = jax.random.normal(kx, (batch, input_size), dtype=jnp.float32)

    # Deterministic parameter init (mimics PyTorch Linear's uniform bound 1/sqrt(fan_in)).
    bound = 1.0 / jnp.sqrt(jnp.float32(input_size))
    w = jax.random.uniform(kw, (num_classes, input_size), dtype=jnp.float32,
                           minval=-bound, maxval=bound)   # PyTorch layout [C, F]
    b = jax.random.uniform(kb, (num_classes,), dtype=jnp.float32,
                           minval=-bound, maxval=bound)

    out = classifier_forward(x, w, b)
    jax.block_until_ready(out)

    # Reference check against plain JAX (same math as torch.nn.Linear).
    ref = x @ w.T + b
    assert out.shape == (batch, num_classes)
    assert jnp.allclose(out, ref, atol=1e-5, rtol=1e-5)

    print("KERNEL_OK")
</pallas_src>

<mosaic_0001>
module attributes {stable_mosaic.version = 11 : i64} {
  func.func @_linear_kernel(%arg0: i32, %arg1: memref<8x16xf32, #tpu.memory_space<vmem>>, %arg2: memref<16x128xf32, #tpu.memory_space<vmem>>, %arg3: memref<1x128xf32, #tpu.memory_space<vmem>>, %arg4: memref<8x128xf32, #tpu.memory_space<vmem>>) attributes {dimension_semantics = [#tpu.dimension_semantics<parallel>], iteration_bounds = array<i64: 1>, scalar_prefetch = 0 : i64, scratch_operands = 0 : i64, tpu.core_type = #tpu.core_type<tc>, window_params = [{transform_indices = @transform_0, window_bounds = array<i64: 8, 16>}, {pipeline_mode = #tpu.pipeline_mode<synchronous>, transform_indices = @transform_1, window_bounds = array<i64: 16, 128>}, {pipeline_mode = #tpu.pipeline_mode<synchronous>, transform_indices = @transform_2, window_bounds = array<i64: 1, 128>}, {transform_indices = @transform_3, window_bounds = array<i64: 8, 128>}]} {
    %c0 = arith.constant 0 : index
    %c0_0 = arith.constant 0 : index
    %0 = vector.load %arg1[%c0, %c0_0] : memref<8x16xf32, #tpu.memory_space<vmem>>, vector<8x16xf32>
    %c0_1 = arith.constant 0 : index
    %c0_2 = arith.constant 0 : index
    %1 = vector.load %arg2[%c0_1, %c0_2] : memref<16x128xf32, #tpu.memory_space<vmem>>, vector<16x128xf32>
    %cst = arith.constant dense<0.000000e+00> : vector<8x128xf32>
    %2 = tpu.matmul %0, %1, %cst {dimension_numbers = #tpu.dot_dimension_numbers<[1], [0], [0], [1], [0, 0, 1, 1], [], []>} : vector<8x16xf32>, vector<16x128xf32>, vector<8x128xf32> -> vector<8x128xf32>
    %c0_3 = arith.constant 0 : index
    %c0_4 = arith.constant 0 : index
    %3 = vector.load %arg3[%c0_3, %c0_4] : memref<1x128xf32, #tpu.memory_space<vmem>>, vector<1x128xf32>
    %4 = vector.broadcast %3 : vector<1x128xf32> to vector<8x128xf32>
    %5 = arith.addf %2, %4 : vector<8x128xf32>
    %c0_5 = arith.constant 0 : index
    %c0_6 = arith.constant 0 : index
    %6 = vector.load %arg4[%c0_5, %c0_6] : memref<8x128xf32, #tpu.memory_space<vmem>>, vector<8x128xf32>
    tpu.vector_store %arg4[%c0_5, %c0_6], %5 {strides = array<i32>} : memref<8x128xf32, #tpu.memory_space<vmem>>, vector<8x128xf32>,
    return
  }
  func.func @transform_0(%arg0: i32) -> (i32, i32) {
    %c0_i32 = arith.constant 0 : i32
    %c0_i32_0 = arith.constant 0 : i32
    return %arg0, %c0_i32 : i32, i32
  }
  func.func @transform_1(%arg0: i32) -> (i32, i32) {
    %c0_i32 = arith.constant 0 : i32
    %c0_i32_0 = arith.constant 0 : i32
    %c0_i32_1 = arith.constant 0 : i32
    return %c0_i32, %c0_i32_0 : i32, i32
  }
  func.func @transform_2(%arg0: i32) -> (i32, i32) {
    %c0_i32 = arith.constant 0 : i32
    %c0_i32_0 = arith.constant 0 : i32
    %c0_i32_1 = arith.constant 0 : i32
    return %c0_i32, %c0_i32_0 : i32, i32
  }
  func.func @transform_3(%arg0: i32) -> (i32, i32) {
    %c0_i32 = arith.constant 0 : i32
    %c0_i32_0 = arith.constant 0 : i32
    return %arg0, %c0_i32 : i32, i32
  }
}

</mosaic_0001>

<bundles_post_ra>
// kernel: tpu_custom_call.1
= control target key start
LH: loop header
LB: loop body
LE: loop exit
PB: predicated region body
PF: predicated region fallthrough
CT: control target
= control target key end

     0   :  { %8 = vsyncpa [#allocation3], 0  ;;  %s266_s0 = inlined_call_operand.hbm [shape: f32[8,16], index: 0, kind: input, shape index: {}]   ;;  %s267_s1 = inlined_call_operand.hbm [shape: f32[16,128], index: 1, kind: input, shape index: {}]   ;;  %s268_s2 = inlined_call_operand.vmem [shape: f32[1,128], index: 2, kind: input, shape index: {}]   ;;  %s269_s3 = inlined_call_operand.hbm [shape: f32[8,128], index: 3, kind: output, shape index: {}]  }
   0x1   :  { %9 = vsyncpa [#allocation6], 0 }
   0x2   :  { %10 = vsyncpa [#allocation4], 0  ;;  %s227_s12 = smov [#allocation2]   ;;  %s228_s14 = smov [#allocation5]  }
   0x3   :  { %s17_s13 = sshll.u32 %s227_s12, 4  ;;  %s26_s15 = sshll.u32 %s228_s14, 4  ;;  %s18_s13 = int_to_ptr.vmem [resolvable:$true] %s17_s13  ;;  %s27_s15 = int_to_ptr.vmem [resolvable:$true] %s26_s15 }
   0x4   :  { %s169_s16 = scalar_lea.vmem %s18_s13, 128  ;;  %p174_p1 = scmp.lt.s32.totalorder %s18_s13, %s18_s13 }
   0x5   :  { %p170_p0 = scmp.ne.s32.totalorder %s18_s13, %s169_s16  ;;  %p175_p2 = scmp.lt.s32.totalorder %s169_s16, %s169_s16 }
   0x7   :  { %p176_p3 = por %p175_p2, %p174_p1 }
   0x9   :  { %p177_p4 = pnand %p176_p3, %p170_p0 }
   0xb   :  { %180 = shalt.err (!%p177_p4)
}
   0xc   :  { %20 = dma.hbm_to_vmem [thread:$0]  %s266_s0, 128, %s18_s13, [#allocation3]  }
   0xd   :  { %s189_s19 = scalar_lea.vmem %s27_s15, 256  ;;  %p194_p6 = scmp.lt.s32.totalorder %s27_s15, %s27_s15 }
   0xe   :  { %p190_p5 = scmp.ne.s32.totalorder %s27_s15, %s189_s19  ;;  %p195_p7 = scmp.lt.s32.totalorder %s189_s19, %s189_s19 }
  0x10   :  { %p196_p8 = por %p195_p7, %p194_p6 }
  0x12   :  { %p197_p9 = pnand %p196_p8, %p190_p5 }
  0x14   :  { %200 = shalt.err (!%p197_p9)
}
  0x15   :  { %s229_s20 = smov 128   ;;  %s230_s21 = smov 8  }
  0x16   :  { %32 = dma.hbm_to_vmem [thread:$0]  %s267_s1, 256, %s27_s15, [#allocation6], %s229_s20, %s229_s20, %s230_s21  }
  0x17   :  { %221 = dma.done.wait [#allocation3], 128  }
  0x18   :  { %222 = vsyncadd [#allocation3], 4294967168 }
  0x19   :  { %223 = dma.done.wait [#allocation6], 256  }
  0x1a   :  { %224 = vsyncadd [#allocation6], 4294967040  ;;  %v231_v0 = vmov 0.0   ;;  %vm232_vm0 = vmmov 0   ;;  %v43_v1 = vld [vmem:[#allocation5 + $0x8] sm:$0xff]  ;;  %v42_v2 = vld [vmem:[#allocation5] sm:$0xff] }
  0x1b   :  { %147 = vmatprep.subr.mxu0 %v231_v0  ;;  %151 = vmatprep.mubr.msk.f32.mxu0 %vm232_vm0, %v231_v0  ;;  %v41_v3 = vld [vmem:[#allocation2] sm:$0xff]  ;;  %vm51_vm1 = vcmask 130048   ;;  %s233_s1 = smov [#allocation7]  }
  0x1c   :  { %148 = vmatpush3.msra.mxu0 %v43_v1  ;;  %v142_v4 = vld [vmem:[%s268_s2] ss:$0 sm:$0xff]  ;;  %s132_s25 = sshll.u32 %s233_s1, 4  ;;  %s133_s25 = int_to_ptr.vmem [resolvable:$true] %s132_s25 }
  0x1d   :  { %149 = vmatprep.subr.mxu0 %v231_v0  ;;  %s201_s26 = scalar_lea.vmem %s133_s25, 128  ;;  %p206_p11 = scmp.lt.s32.totalorder %s133_s25, %s133_s25 }
  0x1e   :  { %150 = vmatpush3.msra.mxu0 %v42_v2  ;;  %p202_p10 = scmp.ne.s32.totalorder %s133_s25, %s201_s26  ;;  %p207_p12 = scmp.lt.s32.totalorder %s201_s26, %s201_s26 }
  0x1f   :  { %152 = vmatmul.mubr.msk.f32.vlgmr.msra.gmra.mxu0 %vm51_vm1, %v41_v3 }
  0x20   :  { %p208_p13 = por %p207_p12, %p206_p11 }
  0x22   :  { %p209_p0 = pnand %p208_p13, %p202_p10 }
  0xdf   :  { %v121_v5 = vpop.f32.mrf.mxu0 }
  0xe0   :  { %v122_v6 = vadd.f32 %v142_v4, %v121_v5 }
  0xe1   :  { %v153_v7 = vpop.f32.mrf.mxu0 }
  0xe2   :  { %125 = vst [vmem:[#allocation7] sm:$0xff] %v122_v6 }
  0xe3   :  { %212 = shalt.err (!%p209_p0)
}
  0xe4   :  { %135 = dma.vmem_to_hbm [thread:$0]  %s133_s25, 128, %s269_s3, [#allocation4]  }
  0xe5   :  { %225 = dma.done.wait [#allocation4], 128  }
  0xe6   :  { %226 = vsyncadd [#allocation4], 4294967168 }
  0xe7   :  { %139 = vsyncpa [#allocation3], 1 }
  0xe8   :  { %140 = vsyncpa [#allocation6], 1 }
  0xe9   :  { %141 = vsyncpa [#allocation4], 1 }

</bundles_post_ra>
